<compile_context>
chip_gen: v7x
topology: tpu7x:2x2x1
jax: 0.10.0
libtpu: 0.0.40
codegen_flags: <defaults>
</compile_context>

<pallas_src>
import jax
import jax.numpy as jnp
from jax.experimental import pallas as pl
from jax.experimental.pallas import tpu as pltpu


def _round_up(x, m):
    return (x + m - 1) // m * m


def _tile_for(dim, cap, align):
    """Pick a tile size <= cap (multiple of `align`) for `dim` (already a
    multiple of `align`) that keeps padding waste small."""
    if dim <= cap:
        return dim
    n_tiles = -(-dim // cap)
    return _round_up(-(-dim // n_tiles), align)


def _default_tile_caps():
    """Generation-aware (tm, tn, tk) caps for the bf16-input / f32-acc matmul.

    Sized so that (2 input buffers x 2) + double-buffered output + f32 acc fit
    comfortably inside each generation's default scoped-VMEM budget:
      v5e : 16 MiB scoped  -> 256/512/512   (~2.5 MiB used)
      v6e : 32 MiB scoped  -> 512/1024/1024 (~12 MiB used)
      v7x : 32 MiB scoped / 64 MiB phys -> 512/512/1024 (~7 MiB used)
    """
    try:
        kind = jax.devices()[0].device_kind.lower()
    except Exception:  # pragma: no cover - defensive; defaults are safe anywhere
        kind = ""
    if "v5 lite" in kind or "v5e" in kind or "v5lite" in kind:
        return 256, 512, 512
    if "v6" in kind:
        return 512, 1024, 1024
    return 512, 512, 1024


# ----------------------------------------------------------------------------
# Kernels
# ----------------------------------------------------------------------------
def _linear_full_kernel(x_ref, wt_ref, b_ref, o_ref):
    """Single-shot (or M-tiled) linear: whole K/N live in one block."""
    acc = jnp.dot(x_ref[...], wt_ref[...], preferred_element_type=jnp.float32)
    o_ref[...] = (acc + b_ref[...]).astype(o_ref.dtype)


def _linear_tiled_kernel(x_ref, wt_ref, b_ref, o_ref, acc_ref):
    """General tiled matmul with K-innermost reduction and f32 accumulator.

    Bias is folded into the k == 0 accumulator init, so there is no epilogue
    add — only a cast at the final store.
    """
    k = pl.program_id(2)

    @pl.when(k == 0)
    def _():
        acc_ref[...] = jnp.broadcast_to(
            b_ref[...].astype(jnp.float32), acc_ref.shape
        )

    acc_ref[...] += jnp.dot(
        x_ref[...], wt_ref[...], preferred_element_type=jnp.float32
    )

    @pl.when(k == pl.num_programs(2) - 1)
    def _():
        o_ref[...] = acc_ref[...].astype(o_ref.dtype)


# ----------------------------------------------------------------------------
# Parameter prep + forward factory (all one-time work hoisted here)
# ----------------------------------------------------------------------------
def make_sender_forward(weight, bias, *, compute_dtype=jnp.bfloat16,
                        tile_caps=None):
    """Build Sender.forward for PyTorch-layout params.

    weight: (n_hidden, n_inputs)   bias: (n_hidden,)

    One-time work done here (NOT per call): weight transpose, bf16 cast,
    K/N padding of the static params, bias reshape, tile selection.
    """
    wt = jnp.asarray(weight).T.astype(compute_dtype)        # (K, N), bf16
    b = jnp.asarray(bias).astype(jnp.float32)                # f32 bias
    K, N = wt.shape
    tm_cap, tn_cap, tk_cap = tile_caps or _default_tile_caps()

    small_kn = (K <= tk_cap) and (N <= tn_cap)
    if small_kn:
        # Full-dim blocks along K/N -> no padding of static params needed.
        wt_prep, b_prep = wt, b.reshape(1, N)
        Kp = Np = tk = tn = None
    else:
        Kp = _round_up(K, 128)
        Np = _round_up(N, 128)
        tk = _tile_for(Kp, tk_cap, 128)
        tn = _tile_for(Np, tn_cap, 128)
        Kp = _round_up(Kp, tk)
        Np = _round_up(Np, tn)
        wt_prep = jnp.pad(wt, ((0, Kp - K), (0, Np - N)))    # padded ONCE here
        b_prep = jnp.pad(b, (0, Np - N)).reshape(1, Np)

    in_itemsize = jnp.dtype(compute_dtype).itemsize

    @jax.jit
    def _fwd(x):
        lead = x.shape[:-1]
        x2 = x.reshape(-1, K)
        M = x2.shape[0]
        out_dtype = x.dtype
        xc = x2.astype(compute_dtype)                        # bf16 MXU path

        if small_kn and M <= tm_cap:
            # ---- tiny fast path: one block, no grid, no pad, no slice ----
            out = pl.pallas_call(
                _linear_full_kernel,
                out_shape=jax.ShapeDtypeStruct((M, N), out_dtype),
            )(xc, wt_prep, b_prep)
            return out.reshape(*lead, N)

        if small_kn:
            # ---- M-tiled path: K/N stay as full blocks, params untouched ----
            Mp = _round_up(M, 8)
            tm = _tile_for(Mp, tm_cap, 8)
            Mp = _round_up(Mp, tm)
            xp = xc if Mp == M else jnp.pad(xc, ((0, Mp - M), (0, 0)))
            out = pl.pallas_call(
                _linear_full_kernel,
                out_shape=jax.ShapeDtypeStruct((Mp, N), out_dtype),
                grid_spec=pltpu.PrefetchScalarGridSpec(
                    num_scalar_prefetch=0,
                    grid=(Mp // tm,),
                    in_specs=[
                        pl.BlockSpec((tm, K), lambda i: (i, 0)),
                        pl.BlockSpec((K, N), lambda i: (0, 0)),
                        pl.BlockSpec((1, N), lambda i: (0, 0)),
                    ],
                    out_specs=pl.BlockSpec((tm, N), lambda i: (i, 0)),
                ),
                compiler_params=pltpu.CompilerParams(
                    dimension_semantics=("parallel",)
                ),
            )(xp, wt_prep, b_prep)
            if Mp != M:
                out = out[:M]
            return out.reshape(*lead, N)

        # ---- fully tiled path (large K and/or N) ----
        Mp = _round_up(M, 8)
        tm = _tile_for(Mp, tm_cap, 8)
        Mp = _round_up(Mp, tm)
        xp = (xc if (Mp == M and Kp == K)
              else jnp.pad(xc, ((0, Mp - M), (0, Kp - K))))

        grid = (Mp // tm, Np // tn, Kp // tk)
        cost = pl.CostEstimate(
            flops=2 * Mp * Np * Kp,
            transcendentals=0,
            # Actual streaming traffic: x re-read per N tile, wt per M tile.
            bytes_accessed=(Mp * Kp * in_itemsize * (Np // tn)
                            + Kp * Np * in_itemsize * (Mp // tm)
                            + Mp * Np * jnp.dtype(out_dtype).itemsize
                            + Np * 4),
        )
        out = pl.pallas_call(
            _linear_tiled_kernel,
            out_shape=jax.ShapeDtypeStruct((Mp, Np), out_dtype),
            grid_spec=pltpu.PrefetchScalarGridSpec(
                num_scalar_prefetch=0,
                grid=grid,
                in_specs=[
                    pl.BlockSpec((tm, tk), lambda i, j, k: (i, k)),
                    # If xprof ever shows exposed weight DMA here, add
                    # pipeline_mode=pl.Buffered(3); by default prefer larger tk.
                    pl.BlockSpec((tk, tn), lambda i, j, k: (k, j)),
                    pl.BlockSpec((1, tn), lambda i, j, k: (0, j)),
                ],
                out_specs=pl.BlockSpec((tm, tn), lambda i, j, k: (i, j)),
                scratch_shapes=[pltpu.VMEM((tm, tn), jnp.float32)],
            ),
            compiler_params=pltpu.CompilerParams(
                dimension_semantics=("parallel", "parallel", "arbitrary")
            ),
            cost_estimate=cost,
        )(xp, wt_prep, b_prep)
        if Mp != M or Np != N:
            out = out[:M, :N]
        return out.reshape(*lead, N)

    def forward(sender_input, aux_input=None):
        # aux_input is accepted for API parity with the PyTorch module but is
        # unused by Sender.forward (matches the reference semantics).
        del aux_input
        return _fwd(jnp.asarray(sender_input))

    return forward


if __name__ == "__main__":
    key = jax.random.PRNGKey(0)
    kx, kw, kb, kx2, kw2, kb2 = jax.random.split(key, 6)

    # --- Small shapes consistent with Sender(n_inputs=16, n_hidden=32) ------
    B, n_inputs, n_hidden = 8, 16, 32
    bound = 1.0 / (n_inputs ** 0.5)
    weight = jax.random.uniform(kw, (n_hidden, n_inputs), jnp.float32, -bound, bound)
    bias = jax.random.uniform(kb, (n_hidden,), jnp.float32, -bound, bound)
    x = jax.random.normal(kx, (B, n_inputs), jnp.float32)

    sender_forward = make_sender_forward(weight, bias)       # bf16 MXU path
    out = jax.block_until_ready(sender_forward(x))
    ref = x @ weight.T + bias
    assert out.shape == (B, n_hidden)
    # bf16 inputs with f32 accumulation -> loosened tolerance vs f32 reference.
    assert jnp.allclose(out, ref, atol=5e-2, rtol=5e-2)

    # --- Also exercise the fully tiled path (padding + K reduction) ---------
    M2, K2, N2 = 96, 1200, 1000
    bound2 = 1.0 / (K2 ** 0.5)
    weight2 = jax.random.uniform(kw2, (N2, K2), jnp.float32, -bound2, bound2)
    bias2 = jax.random.uniform(kb2, (N2,), jnp.float32, -bound2, bound2)
    x2 = jax.random.normal(kx2, (M2, K2), jnp.float32)

    fwd2 = make_sender_forward(weight2, bias2)
    out2 = jax.block_until_ready(fwd2(x2))
    ref2 = x2 @ weight2.T + bias2
    assert out2.shape == (M2, N2)
    assert jnp.allclose(out2, ref2, atol=5e-2, rtol=5e-2)

    print("KERNEL_OK")
</pallas_src>

<mosaic_0001>
module attributes {stable_mosaic.version = 11 : i64} {
  func.func @_linear_full_kernel(%arg0: memref<8x16xbf16, #tpu.memory_space<vmem>>, %arg1: memref<16x32xbf16, #tpu.memory_space<vmem>>, %arg2: memref<1x32xf32, #tpu.memory_space<vmem>>, %arg3: memref<8x32xf32, #tpu.memory_space<vmem>>) attributes {dimension_semantics = [], scalar_prefetch = 0 : i64, scratch_operands = 0 : i64, tpu.core_type = #tpu.core_type<tc>} {
    %c0 = arith.constant 0 : index
    %c0_0 = arith.constant 0 : index
    %0 = vector.load %arg0[%c0, %c0_0] : memref<8x16xbf16, #tpu.memory_space<vmem>>, vector<8x16xbf16>
    %c0_1 = arith.constant 0 : index
    %c0_2 = arith.constant 0 : index
    %1 = vector.load %arg1[%c0_1, %c0_2] : memref<16x32xbf16, #tpu.memory_space<vmem>>, vector<16x32xbf16>
    %cst = arith.constant dense<0.000000e+00> : vector<8x32xf32>
    %2 = tpu.matmul %0, %1, %cst {dimension_numbers = #tpu.dot_dimension_numbers<[1], [0], [0], [1], [0, 0, 1, 1], [], []>} : vector<8x16xbf16>, vector<16x32xbf16>, vector<8x32xf32> -> vector<8x32xf32>
    %c0_3 = arith.constant 0 : index
    %c0_4 = arith.constant 0 : index
    %3 = vector.load %arg2[%c0_3, %c0_4] : memref<1x32xf32, #tpu.memory_space<vmem>>, vector<1x32xf32>
    %4 = vector.broadcast %3 : vector<1x32xf32> to vector<8x32xf32>
    %5 = arith.addf %2, %4 : vector<8x32xf32>
    %c0_5 = arith.constant 0 : index
    %c0_6 = arith.constant 0 : index
    %6 = vector.load %arg3[%c0_5, %c0_6] : memref<8x32xf32, #tpu.memory_space<vmem>>, vector<8x32xf32>
    tpu.vector_store %arg3[%c0_5, %c0_6], %5 {strides = array<i32>} : memref<8x32xf32, #tpu.memory_space<vmem>>, vector<8x32xf32>,
    return
  }
}

</mosaic_0001>

<bundles_post_ra>
// kernel: _fwd.1
= control target key start
LH: loop header
LB: loop body
LE: loop exit
PB: predicated region body
PF: predicated region fallthrough
CT: control target
= control target key end

     0   :  { %v131_v1 = vmov 0.0   ;;  %vm132_vm0 = vmmov 0   ;;  %vm32_vm1 = vcmask 130048   ;;  %s175_s0 = inlined_call_operand.vmem [shape: bf16[8,16], index: 0, kind: input, shape index: {}]   ;;  %s176_s1 = inlined_call_operand.vmem [shape: bf16[16,32], index: 1, kind: input, shape index: {}]   ;;  %s177_s2 = inlined_call_operand.vmem [shape: f32[1,32], index: 2, kind: input, shape index: {}]   ;;  %s178_s3 = inlined_call_operand.hbm [shape: f32[8,32], index: 3, kind: output, shape index: {}]  }
   0x1   :  { %v106_v0 = vld [vmem:[%s176_s1] sm:$0xff]   ;;  %97 = vmatprep.subr.bf16.mxu0 %v131_v1  ;;  %99 = vmatprep.mubr.msk.bf16.mxu0 %vm132_vm0, %v131_v1 }
   0x2   :  { %98 = vmatpush3.bf16.msra.mxu0 %v106_v0  ;;  %v16_v2 = vld [vmem:[%s175_s0] sm:$0xf] }
   0x3   :  { %8 = vsyncpa [#allocation3], 0  ;;  %v92_v3 = vld [vmem:[%s177_s2] ss:$0 sm:$0xff]  ;;  %s133_s18 = smov [#allocation2]   ;;  %vm76_vm2 = vcmask 261120  }
   0x4   :  { %s84_s19 = sshll.u32 %s133_s18, 4  ;;  %s85_s19 = int_to_ptr.vmem [resolvable:$true] %s84_s19 }
   0x5   :  { %100 = vmatmul.mubr.msk.bf16.vlgmr.msra.gmra.mrb[0].mxu0 %vm32_vm1, %v16_v2  ;;  %s107_s1 = scalar_lea.vmem %s85_s19, 128  ;;  %p112_p1 = scmp.lt.s32.totalorder %s85_s19, %s85_s19 }
   0x6   :  { %p108_p0 = scmp.ne.s32.totalorder %s85_s19, %s107_s1  ;;  %p113_p2 = scmp.lt.s32.totalorder %s107_s1, %s107_s1 }
   0x8   :  { %p114_p3 = por %p113_p2, %p112_p1 }
   0xa   :  { %p115_p4 = pnand %p114_p3, %p108_p0 }
  0xd8   :  { %v70_v4 = vpop.f32.mrb[0].mxu0 }
  0xd9   :  { %v71_v5 = vadd.f32 %v92_v3, %v70_v4  ;;  %v101_v6 = vpop.f32.mrb[1].mxu0 }
  0xda   :  { %v73_v7 = vpop.f32.mrb[2].mxu0 }
  0xdb   :  { %v102_v8 = vpop.f32.mrb[3].mxu0  ;;  %77 = vst.msk [vmem:[#allocation2] sm:$0xff] %vm76_vm2, %v71_v5 }
  0xdc   :  { %118 = shalt.err (!%p115_p4)
}
  0xdd   :  { %s119_s2 = scalar_lea.hbm %s178_s3, 128 }
  0xde   :  { %p120_p5 = scmp.ne.s32.totalorder %s178_s3, %s119_s2  ;;  %p123_p6 = scmp.lt.u32.totalorder %s119_s2, %s178_s3 }
  0xe0   :  { %p125_p7 = pnand %p123_p6, %p120_p5 }
  0xe2   :  { %128 = shalt.err (!%p125_p7)
}
  0xe3   :  { %87 = dma.vmem_to_hbm [thread:$0]  %s85_s19, 128, %s178_s3, [#allocation3]  }
  0xe4   :  { %129 = dma.done.wait [#allocation3], 128  }
  0xe5   :  { %130 = vsyncadd [#allocation3], 4294967168 }
  0xe6   :  { %91 = vsyncpa [#allocation3], 1 }

</bundles_post_ra>
